<compile_context>
chip_gen: v7x
topology: tpu7x:2x2x1
jax: 0.10.0
libtpu: 0.0.40
codegen_flags: <defaults>
</compile_context>

<pallas_src>
import jax
import jax.numpy as jnp
from jax.experimental import pallas as pl
from jax.experimental.pallas import tpu as pltpu


def _round_up(x, m):
    return ((x + m - 1) // m) * m


def _cdiv(a, b):
    return -(-a // b)


def _vmem_limit(nbytes):
    # Leave the scoped-VMEM default unless the tiles actually need more; cap at
    # 48 MiB so an explicit budget is also safe on v7x's 64 MiB physical VMEM.
    if nbytes <= 24 * 1024 * 1024:
        return None
    return min(48 * 1024 * 1024, _round_up(nbytes, 1 << 20) + (8 << 20))


def _pick_tiles(M, K, Cout, *, budget_bytes=24 * 1024 * 1024, tm1_cap=2048, tm2_cap=4096):
    """Pick M-tiles for the two passes.

    Pass-1 tile is sized from the VMEM budget (double-buffered bf16 patches +
    bf16 conv tile + f32 accumulator); pass 2 is a pure streaming FMA with no
    weight so it gets a larger tile.  When M is big enough we keep >= 2 grid
    steps so the "parallel" M axis gives both v7x TensorCores work.
    """
    per_row1 = 2 * K * 2 + 2 * Cout * 2 + Cout * 4
    tm1_max = max(256, min(tm1_cap, (budget_bytes // per_row1) // 256 * 256))
    tm1 = min(tm1_max, _round_up(M, 8))
    if _cdiv(M, tm1) < 2 and M > 16:
        tm1 = _round_up(_cdiv(M, 2), 8)          # split so both cores get a tile
    n1 = _cdiv(M, tm1)
    mp = n1 * tm1
    # Pass-2 tile: a multiple of tm1 (both passes share Mp), as large as allowed,
    # but keep >= 2 grid steps whenever pass 1 has >= 2.
    f_cap = max(1, tm2_cap // tm1)
    if n1 >= 2:
        f_cap = min(f_cap, n1 // 2)
    f = 1
    for cand in range(f_cap, 0, -1):
        if n1 % cand == 0:
            f = cand
            break
    return tm1, n1, tm1 * f, n1 // f, mp


# ---------- Pass 1: conv matmul (MXU, bf16 in / f32 acc) + per-tile channel stats ----------
def conv_stats_kernel(p_ref, w_ref, conv_ref, psum_ref, psq_ref):
    # p_ref: [TM, K] bf16, w_ref: [K, Cout] bf16
    conv = jnp.dot(p_ref[...], w_ref[...], preferred_element_type=jnp.float32)
    conv_ref[...] = conv.astype(conv_ref.dtype)                       # bf16 intermediate
    psum_ref[0, :, :] = jnp.sum(conv, axis=0, keepdims=True)          # f32 partial stats
    psq_ref[0, :, :] = jnp.sum(conv * conv, axis=0, keepdims=True)


# ---------- Pass 2: folded BN affine (single FMA) + ReLU6 ----------
def bn_relu6_kernel(conv_ref, scale_ref, shift_ref, o_ref):
    y = conv_ref[...].astype(jnp.float32) * scale_ref[...] + shift_ref[...]
    o_ref[...] = jnp.minimum(jnp.maximum(y, 0.0), 6.0)


def conv_block_forward(x_nchw, weight, bias, gamma, beta, *, stride, padding, eps=1e-5):
    # The conv bias is mathematically cancelled by the BN mean subtraction
    # (training-mode batch statistics), so it never enters the kernels.
    del bias

    N, Cin, H, W = x_nchw.shape
    Cout, _, KH, KW = weight.shape
    OH = (H + 2 * padding - KH) // stride + 1
    OW = (W + 2 * padding - KW) // stride + 1

    M = N * OH * OW
    K = KH * KW * Cin
    tm1, n1, tm2, n2, Mp = _pick_tiles(M, K, Cout)

    # --- XLA glue: NCHW -> NHWC (bf16), spatial pad, im2col (kh, kw, cin order) ---
    x = jnp.transpose(x_nchw, (0, 2, 3, 1)).astype(jnp.bfloat16)
    x = jnp.pad(x, ((0, 0), (padding, padding), (padding, padding), (0, 0)))
    cols = []
    for kh in range(KH):
        for kw in range(KW):
            cols.append(x[:, kh:kh + stride * OH:stride, kw:kw + stride * OW:stride, :])
    patches = jnp.stack(cols, axis=3).reshape(M, K)
    patches = jnp.pad(patches, ((0, Mp - M), (0, 0)))                  # [Mp, K] bf16, no K pad

    # Conv weight [Cout, Cin, KH, KW] -> [K, Cout] in (kh, kw, cin) order, no padding.
    w2d = jnp.transpose(weight, (2, 3, 1, 0)).reshape(K, Cout).astype(jnp.bfloat16)

    # --- Pass 1: tiled matmul + partial channel stats (bf16 conv intermediate) ---
    vmem1 = 2 * tm1 * K * 2 + 2 * K * Cout * 2 + 2 * tm1 * Cout * 2 + tm1 * Cout * 4
    conv2d, psum, psq = pl.pallas_call(
        conv_stats_kernel,
        grid=(n1,),
        in_specs=[
            pl.BlockSpec((tm1, K), lambda i: (i, 0)),
            pl.BlockSpec((K, Cout), lambda i: (0, 0)),
        ],
        out_specs=(
            pl.BlockSpec((tm1, Cout), lambda i: (i, 0)),
            pl.BlockSpec((1, 1, Cout), lambda i: (i, 0, 0)),
            pl.BlockSpec((1, 1, Cout), lambda i: (i, 0, 0)),
        ),
        out_shape=(
            jax.ShapeDtypeStruct((Mp, Cout), jnp.bfloat16),
            jax.ShapeDtypeStruct((n1, 1, Cout), jnp.float32),
            jax.ShapeDtypeStruct((n1, 1, Cout), jnp.float32),
        ),
        compiler_params=pltpu.CompilerParams(
            dimension_semantics=("parallel",),
            vmem_limit_bytes=_vmem_limit(vmem1)),
    )(patches, w2d)

    # --- Global BN batch statistics (biased variance, PyTorch BN training mode) ---
    # Zero-padded M rows produce exactly-zero conv rows (no bias in the kernel),
    # so they add nothing to the sums; divide by the true M.
    mean = jnp.sum(psum[:, 0, :], axis=0) / M
    ex2 = jnp.sum(psq[:, 0, :], axis=0) / M
    var = jnp.maximum(ex2 - mean * mean, 0.0)        # guard one-pass variance
    scale = gamma.astype(jnp.float32) * jax.lax.rsqrt(var + eps)
    shift = beta.astype(jnp.float32) - mean * scale
    scale = scale.reshape(1, Cout)
    shift = shift.reshape(1, Cout)

    # --- Pass 2: tiled BN FMA + ReLU6 (larger, weight-free streaming tile) ---
    vmem2 = 2 * tm2 * Cout * 2 + 2 * tm2 * Cout * 4
    out2d = pl.pallas_call(
        bn_relu6_kernel,
        grid=(n2,),
        in_specs=[
            pl.BlockSpec((tm2, Cout), lambda i: (i, 0)),
            pl.BlockSpec((1, Cout), lambda i: (0, 0)),
            pl.BlockSpec((1, Cout), lambda i: (0, 0)),
        ],
        out_specs=pl.BlockSpec((tm2, Cout), lambda i: (i, 0)),
        out_shape=jax.ShapeDtypeStruct((Mp, Cout), jnp.float32),
        compiler_params=pltpu.CompilerParams(
            dimension_semantics=("parallel",),
            vmem_limit_bytes=_vmem_limit(vmem2)),
    )(conv2d, scale, shift)

    # [Mp, Cout] -> valid [M, Cout] -> [N, OH, OW, Cout] -> NCHW
    out = out2d[:M, :].reshape(N, OH, OW, Cout)
    return jnp.transpose(out, (0, 3, 1, 2))


def _reference(x, weight, bias, gamma, beta, *, stride, padding, eps=1e-5):
    conv = jax.lax.conv_general_dilated(
        x, weight, (stride, stride), [(padding, padding), (padding, padding)],
        dimension_numbers=("NCHW", "OIHW", "NCHW"),
    ) + bias[None, :, None, None]
    mean = conv.mean(axis=(0, 2, 3), keepdims=True)
    var = ((conv - mean) ** 2).mean(axis=(0, 2, 3), keepdims=True)
    y = (conv - mean) / jnp.sqrt(var + eps) * gamma[None, :, None, None] + beta[None, :, None, None]
    return jnp.clip(y, 0.0, 6.0)


if __name__ == "__main__":
    # Module config: conv_block(in_channels=4, out_channels=8, kernel_size=3, stride=1, padding=1)
    N, Cin, H, W = 2, 4, 16, 16
    Cout, KH, KW = 8, 3, 3
    stride, padding = 1, 1

    key = jax.random.PRNGKey(0)
    kx, kw, kb, kg, kbeta = jax.random.split(key, 5)

    x = jax.random.normal(kx, (N, Cin, H, W), dtype=jnp.float32)
    weight = 0.1 * jax.random.normal(kw, (Cout, Cin, KH, KW), dtype=jnp.float32)
    bias = 0.1 * jax.random.normal(kb, (Cout,), dtype=jnp.float32)
    gamma = 1.0 + 0.1 * jax.random.normal(kg, (Cout,), dtype=jnp.float32)
    beta = 0.1 * jax.random.normal(kbeta, (Cout,), dtype=jnp.float32)

    out = conv_block_forward(x, weight, bias, gamma, beta, stride=stride, padding=padding)
    out = jax.block_until_ready(out)

    ref = _reference(x, weight, bias, gamma, beta, stride=stride, padding=padding)
    assert out.shape == (N, Cout, H, W), out.shape
    # bf16 matmul operands + bf16 conv intermediate -> loosened tolerance
    # (anticipated in the perf review: expect ~1e-2 level error vs the f32 ref).
    err = float(jnp.max(jnp.abs(out - ref)))
    assert err < 5e-2, err

    print("KERNEL_OK")
</pallas_src>

<mosaic_0001>
module attributes {stable_mosaic.version = 11 : i64} {
  func.func @conv_stats_kernel(%arg0: i32, %arg1: memref<256x36xbf16, #tpu.memory_space<vmem>>, %arg2: memref<36x8xbf16, #tpu.memory_space<vmem>>, %arg3: memref<256x8xbf16, #tpu.memory_space<vmem>>, %arg4: memref<1x1x8xf32, #tpu.memory_space<vmem>>, %arg5: memref<1x1x8xf32, #tpu.memory_space<vmem>>) attributes {dimension_semantics = [#tpu.dimension_semantics<parallel>], iteration_bounds = array<i64: 2>, scalar_prefetch = 0 : i64, scratch_operands = 0 : i64, tpu.core_type = #tpu.core_type<tc>, window_params = [{transform_indices = @transform_0, window_bounds = array<i64: 256, 36>}, {pipeline_mode = #tpu.pipeline_mode<synchronous>, transform_indices = @transform_1, window_bounds = array<i64: 36, 8>}, {transform_indices = @transform_2, window_bounds = array<i64: 256, 8>}, {transform_indices = @transform_3, window_bounds = array<i64: 1, 1, 8>}, {transform_indices = @transform_4, window_bounds = array<i64: 1, 1, 8>}]} {
    %c0 = arith.constant 0 : index
    %c0_0 = arith.constant 0 : index
    %0 = vector.load %arg1[%c0, %c0_0] : memref<256x36xbf16, #tpu.memory_space<vmem>>, vector<256x36xbf16>
    %c0_1 = arith.constant 0 : index
    %c0_2 = arith.constant 0 : index
    %1 = vector.load %arg2[%c0_1, %c0_2] : memref<36x8xbf16, #tpu.memory_space<vmem>>, vector<36x8xbf16>
    %cst = arith.constant dense<0.000000e+00> : vector<256x8xf32>
    %2 = tpu.matmul %0, %1, %cst {dimension_numbers = #tpu.dot_dimension_numbers<[1], [0], [0], [1], [0, 0, 1, 1], [], []>} : vector<256x36xbf16>, vector<36x8xbf16>, vector<256x8xf32> -> vector<256x8xf32>
    %3 = arith.truncf %2 : vector<256x8xf32> to vector<256x8xbf16>
    %c0_3 = arith.constant 0 : index
    %c0_4 = arith.constant 0 : index
    %4 = vector.load %arg3[%c0_3, %c0_4] : memref<256x8xbf16, #tpu.memory_space<vmem>>, vector<256x8xbf16>
    tpu.vector_store %arg3[%c0_3, %c0_4], %3 {strides = array<i32>} : memref<256x8xbf16, #tpu.memory_space<vmem>>, vector<256x8xbf16>,
    %cst_5 = arith.constant dense<0.000000e+00> : vector<8xf32>
    %5 = vector.multi_reduction <add>, %2, %cst_5 [0] : vector<256x8xf32> to vector<8xf32>
    %6 = vector.shape_cast %5 : vector<8xf32> to vector<1x8xf32>
    %c0_6 = arith.constant 0 : index
    %c0_7 = arith.constant 0 : index
    %c0_8 = arith.constant 0 : index
    %7 = vector.load %arg4[%c0_6, %c0_7, %c0_8] : memref<1x1x8xf32, #tpu.memory_space<vmem>>, vector<1x1x8xf32>
    %8 = vector.shape_cast %7 : vector<1x1x8xf32> to vector<1x8xf32>
    %9 = vector.shape_cast %6 : vector<1x8xf32> to vector<1x1x8xf32>
    tpu.vector_store %arg4[%c0_6, %c0_7, %c0_8], %9 {strides = array<i32>} : memref<1x1x8xf32, #tpu.memory_space<vmem>>, vector<1x1x8xf32>,
    %10 = arith.mulf %2, %2 : vector<256x8xf32>
    %cst_9 = arith.constant dense<0.000000e+00> : vector<8xf32>
    %11 = vector.multi_reduction <add>, %10, %cst_9 [0] : vector<256x8xf32> to vector<8xf32>
    %12 = vector.shape_cast %11 : vector<8xf32> to vector<1x8xf32>
    %c0_10 = arith.constant 0 : index
    %c0_11 = arith.constant 0 : index
    %c0_12 = arith.constant 0 : index
    %13 = vector.load %arg5[%c0_10, %c0_11, %c0_12] : memref<1x1x8xf32, #tpu.memory_space<vmem>>, vector<1x1x8xf32>
    %14 = vector.shape_cast %13 : vector<1x1x8xf32> to vector<1x8xf32>
    %15 = vector.shape_cast %12 : vector<1x8xf32> to vector<1x1x8xf32>
    tpu.vector_store %arg5[%c0_10, %c0_11, %c0_12], %15 {strides = array<i32>} : memref<1x1x8xf32, #tpu.memory_space<vmem>>, vector<1x1x8xf32>,
    return
  }
  func.func @transform_0(%arg0: i32) -> (i32, i32) {
    %c0_i32 = arith.constant 0 : i32
    %c0_i32_0 = arith.constant 0 : i32
    return %arg0, %c0_i32 : i32, i32
  }
  func.func @transform_1(%arg0: i32) -> (i32, i32) {
    %c0_i32 = arith.constant 0 : i32
    %c0_i32_0 = arith.constant 0 : i32
    %c0_i32_1 = arith.constant 0 : i32
    return %c0_i32, %c0_i32_0 : i32, i32
  }
  func.func @transform_2(%arg0: i32) -> (i32, i32) {
    %c0_i32 = arith.constant 0 : i32
    %c0_i32_0 = arith.constant 0 : i32
    return %arg0, %c0_i32 : i32, i32
  }
  func.func @transform_3(%arg0: i32) -> (i32, i32, i32) {
    %c0_i32 = arith.constant 0 : i32
    %c0_i32_0 = arith.constant 0 : i32
    %c0_i32_1 = arith.constant 0 : i32
    return %arg0, %c0_i32, %c0_i32_0 : i32, i32, i32
  }
  func.func @transform_4(%arg0: i32) -> (i32, i32, i32) {
    %c0_i32 = arith.constant 0 : i32
    %c0_i32_0 = arith.constant 0 : i32
    %c0_i32_1 = arith.constant 0 : i32
    return %arg0, %c0_i32, %c0_i32_0 : i32, i32, i32
  }
}

</mosaic_0001>

<bundles_post_ra>
// kernel: tpu_custom_call.1
= control target key start
LH: loop header
LB: loop body
LE: loop exit
PB: predicated region body
PF: predicated region fallthrough
CT: control target
= control target key end

     0   :  { %10 = vsyncpa [#allocation3], 0  ;;  %s1845_s0 = inlined_call_operand.vmem [shape: bf16[512,36], index: 0, kind: input, shape index: {}]   ;;  %s1846_s1 = inlined_call_operand.vmem [shape: bf16[36,8], index: 1, kind: input, shape index: {}]   ;;  %s1847_s2 = inlined_call_operand.vmem [shape: bf16[512,8], index: 2, kind: output, shape index: {0}]   ;;  %s1848_s3 = inlined_call_operand.hbm [shape: f32[2,1,8], index: 3, kind: output, shape index: {1}]   ;;  %s1849_s4 = inlined_call_operand.hbm [shape: f32[2,1,8], index: 4, kind: output, shape index: {2}]  }
   0x1   :  { %12 = vsyncpa [#allocation3 + $0x1], 0 }
   0x2   :  { %13 = vsyncpa [#allocation5], 0 }
   0x3   :  { %15 = vsyncpa [#allocation5 + $0x1], 0  ;;  %s1411_s15 = smov 0   ;;  %s1413_s16 = smov 0  }
   0x4   :  { %s1415_s17 = smov 0   ;;  %s1417_s18 = smov 0  }
   0x5 LB: > { %s1432_s19 = sadd.s32 4294967295, %s1382_s18   ;;  %s1049_s20 = sadd.s32 4294967294, %s1382_s18   ;;  %s1382_s18 = sphi %s1417_s18, %s1855_s18   ;;  %s1378_s17 = sphi %s1415_s17, %s1854_s17   ;;  %s1374_s16 = sphi %s1413_s16, %s1853_s16   ;;  %s1370_s15 = sphi %s1411_s15, %s1852_s15  }
   0x6   : > { %s1436_s21 = sadd.s32 1, %s1382_s18   ;;  %s101_s22 = sadd.s32 1, %s1378_s17 }
   0x7   : > { %s98_s23 = ssub.s32 %s1382_s18, %s1436_s21  ;;  %p111_p0 = scmp.ne.s32.totalorder %s1378_s17, %s1374_s16 }
   0x8   : > { %p99_p1 = scmp.eq.s32.totalorder %s98_s23, 0  ;;  %p112_p2 = scmp.eq.s32.totalorder %s1432_s19, 1 }
   0x9   : > { %p117_p3 = scmp.ne.s32.totalorder %s1374_s16, %s1370_s15  ;;  %p118_p4 = scmp.eq.s32.totalorder %s1049_s20, 1 }
   0xa   : > { %s1447_s24 = scalar_select %p99_p1, %s1378_s17, %s101_s22  }
   0xb   : > { %p1449_p5 = por %p112_p2, %p111_p0  ;;  %p1453_p6 = por %p118_p4, %p117_p3 }
   0xc   : > { %p1052_p7 = scmp.ge.s32.totalorder %s1382_s18, 1  ;;  %p174_p8 = scmp.lt.s32.totalorder %s1382_s18, 3 }
   0xe   : > { %p175_p9 = pnand %p1052_p7, %p174_p8 }
   0xf   : > { %v1269_v0 = vld [vmem:[%s1846_s1] sm:$0xff] (!%p175_p9)   ;;  %v1270_v1 = vld [vmem:[%s1846_s1 + $0x8] sm:$0xff] (!%p175_p9)   ;;  %s1053_s5 = sshll.u32 (!%p175_p9), %s1432_s19, 5  ;;  %v1271_v2 = vld [vmem:[%s1846_s1 + $0x10] ss:$0 sps:$4 sm:$0x33] (!%p175_p9)  }
  0x10   : > { %178 = sbr.rel (%p175_p9) target bundleno = 355 (0x163), region = 28  ;;  %1179 = vmatprep.subr.bf16.mxu0 (!%p175_p9), %v1269_v0  ;;  %p209_p10 = scmp.lt.s32.totalorder (!%p175_p9), %s1053_s5, 63  ;;  %1217 = vmatprep.subr.bf16.mxu1 (!%p175_p9), %v1269_v0  ;;  %vm402_vm0 = vcmask (!%p175_p9), 1041408   ;;  %vm353_vm1 = vcmask (!%p175_p9), 293888   ;;  %vm695_vm2 = vcmask (!%p175_p9), 60416   ;;  %vm728_vm3 = vcmask (!%p175_p9), 64512  }
  0x11   : > { %1180 = vmatpush3.bf16.msra.mxu0 (!%p175_p9), %v1269_v0  ;;  %1220 = vmatpush3.bf16.msra.mxu1 (!%p175_p9), %v1269_v0  ;;  %v404_v3 = vsel (!%p175_p9), %vm402_vm0, %v1271_v2, 0  ;;  %s1759_s20 = sand.u32 (!%p175_p9), 1, %s1374_s16   ;;  %s1124_s22 = sshll.u32 (!%p175_p9), %s1432_s19, 4  ;;  %vm798_vm4 = vcmask (!%p175_p9), 57344  }
  0x12   : > { %1181 = vmatprep.subr.bf16.mxu0 (!%p175_p9), %v1270_v1  ;;  %1218 = vmatprep.subr.bf16.mxu1 (!%p175_p9), %v1270_v1  ;;  %s201_s23 = scalar_lea.vmem (!%p175_p9), [#allocation2], %s1759_s20  ;;  %s207_s28 = scalar_lea.vmem (!%p175_p9), [#allocation4], %s1759_s20 }
  0x13   : > { %s928_s27 = sshll.u32 (!%p175_p9), %s201_s23, 4  ;;  %s941_s29 = sshll.u32 (!%p175_p9), %s207_s28, 4  ;;  %s1771_s27 = int_to_ptr.vmem [resolvable:$true] %s928_s27  ;;  %s1779_s29 = int_to_ptr.vmem [resolvable:$true] %s941_s29 }
  0x14   : > { %s1769_s6 = scalar_lea.hbm (!%p175_p9), %s1848_s3, %s1124_s22  ;;  %s908_s9 = scalar_lea.sflag (!%p175_p9), [#allocation3], %s1759_s20 }
  0x15   : > { %1182 = vmatpush3.bf16.msra.mxu0 (!%p175_p9), %v1270_v1  ;;  %1221 = vmatpush3.bf16.msra.mxu1 (!%p175_p9), %v1270_v1  ;;  %s1288_s10 = scalar_lea.vmem (!%p175_p9), %s1771_s27, 16 }
  0x16   : > { %1223 = vmatprep.subr.msk.bf16.mxu0 (!%p175_p9), %vm402_vm0, %v1271_v2  ;;  %1224 = vmatprep.subr.msk.bf16.mxu1 (!%p175_p9), %vm402_vm0, %v1271_v2  ;;  %p1289_p11 = scmp.ne.s32.totalorder (!%p175_p9), %s1771_s27, %s1288_s10 }
  0x17   : > { %s1857_s5 = smov (!%p209_p10, %s1053_s5), 63 }
  0x18   : > { %s1054_s8 = sshll.u32 %s1857_s5, 2  ;;  %p1290_p12 = pnand %p1289_p11, %p1449_p5 }
  0x19   : > { %s1477_s11 = scalar_lea.vmem %s1845_s0, %s1054_s8  ;;  %1184 = vmatpush3.bf16.msra.mxu0 %v404_v3  ;;  %1222 = vmatpush3.bf16.msra.mxu1 %v404_v3  ;;  %s1516_s14 = scalar_lea.vmem %s1847_s2, %s1054_s8 }
  0x1a   : > { %v1272_v4 = vld [vmem:[%s1477_s11] sm:$0xff]   ;;  %v1273_v5 = vld [vmem:[%s1477_s11 + $0x8] sm:$0xff]   ;;  %v1274_v6 = vld [vmem:[%s1477_s11 + $0x10] sm:$0xff]   ;;  %s1777_s8 = scalar_lea.hbm %s1849_s4, %s1124_s22  ;;  %p1291_p13 = pneg %p1290_p12 }
  0x1b   : > { %1185 = vmatprep.mubr.msk.bf16.mxu0 %vm353_vm1, %v1272_v4  ;;  %v1275_v7 = vld [vmem:[%s1477_s11 + $0x18] sm:$0xff]   ;;  %v1280_v8 = vld [vmem:[%s1477_s11 + $0x40] sm:$0xff]   ;;  %v1281_v9 = vld [vmem:[%s1477_s11 + $0x48] sm:$0xff]  }
  0x1c   : > { %1186 = vmatmul.mubr.msk.bf16.vlgmr.msra.gmra.mrb[0].mxu0 %vm353_vm1, %v1273_v5  ;;  %1201 = vmatprep.mubr.msk.bf16.mxu1 %vm353_vm1, %v1280_v8  ;;  %v1282_v10 = vld [vmem:[%s1477_s11 + $0x50] sm:$0xff]   ;;  %v1276_v11 = vld [vmem:[%s1477_s11 + $0x20] sm:$0xff]   ;;  %v1283_v12 = vld [vmem:[%s1477_s11 + $0x58] sm:$0xff]  }
  0x1d   : > { %1189 = vmatprep.mubr.msk.bf16.mxu0 %vm353_vm1, %v1274_v6  ;;  %1202 = vmatmul.mubr.msk.bf16.vlgmr.msra.gmra.mrb[0].mxu1 %vm353_vm1, %v1281_v9  ;;  %v1284_v13 = vld [vmem:[%s1477_s11 + $0x60] sm:$0xff]   ;;  %v1277_v14 = vld [vmem:[%s1477_s11 + $0x28] sm:$0xff]   ;;  %v1278_v15 = vld [vmem:[%s1477_s11 + $0x30] sm:$0xff]  }
  0x1e   : > { %1205 = vmatprep.mubr.msk.bf16.mxu1 %vm353_vm1, %v1282_v10  ;;  %v1285_v16 = vld [vmem:[%s1477_s11 + $0x68] sm:$0xff]   ;;  %v1286_v17 = vld [vmem:[%s1477_s11 + $0x70] sm:$0xff]   ;;  %v1279_v18 = vld [vmem:[%s1477_s11 + $0x38] sm:$0xff]  }
  0x1f   : > { %v1287_v19 = vld [vmem:[%s1477_s11 + $0x78] sm:$0xff]   ;;  %s1384_s11 = smov [#allocation2]  }
  0x20   : > { %s1292_s12 = sshll.u32 %s1384_s11, 4  ;;  %s1293_s12 = int_to_ptr.vmem [resolvable:$false] %s1292_s12 }
  0x21   : > { %s1294_s13 = scalar_lea.vmem %s1293_s12, 32  ;;  %p1295_p0 = scmp.lt.s32.totalorder %s1771_s27, %s1293_s12 }
  0x22   : > { %p1296_p1 = scmp.lt.s32.totalorder %s1294_s13, %s1288_s10 }
  0x24   : > { %1190 = vmatmul.mubr.msk.bf16.gmra.mrb[4].mxu0 %vm353_vm1, %v1275_v7  ;;  %p1297_p2 = por %p1296_p1, %p1295_p0 }
  0x25   : > { %1193 = vmatprep.mubr.msk.bf16.mxu0 %vm353_vm1, %v1276_v11  ;;  %1206 = vmatmul.mubr.msk.bf16.gmra.mrb[4].mxu1 %vm353_vm1, %v1283_v12 }
  0x26   : > { %1209 = vmatprep.mubr.msk.bf16.mxu1 %vm353_vm1, %v1284_v13  ;;  %p1298_p3 = pnand %p1297_p2, %p1291_p13 }
  0x2c   : > { %1194 = vmatmul.mubr.msk.bf16.gmra.mrb[8].mxu0 %vm353_vm1, %v1277_v14 }
  0x2d   : > { %1197 = vmatprep.mubr.msk.bf16.mxu0 %vm353_vm1, %v1278_v15  ;;  %1210 = vmatmul.mubr.msk.bf16.gmra.mrb[8].mxu1 %vm353_vm1, %v1285_v16 }
  0x2e   : > { %1213 = vmatprep.mubr.msk.bf16.mxu1 %vm353_vm1, %v1286_v17 }
  0x34   : > { %1198 = vmatmul.mubr.msk.bf16.gmra.mrb[12].mxu0 %vm353_vm1, %v1279_v18 }
  0x35   : > { %1214 = vmatmul.mubr.msk.bf16.gmra.mrb[12].mxu1 %vm353_vm1, %v1287_v19 }
  0xef   : > { %v1187_v20 = vpop.f32.mrb[0].mxu0 }
  0xf0   : > { %v1130_v21 = vpack.c.bf16 %v1187_v20, %v1187_v20  ;;  %v440_v22 = vpop.f32.mrb[1].mxu0  ;;  %v802_v26 = vmul.f32 %v1187_v20, %v1187_v20  ;;  %v1526_v35 = vpop.f32.mrb[0].mxu1  ;;  %v732_v36 = vsel %vm728_vm3, %v1187_v20, 0.0 }
  0xf1   : > { %v1128_v23 = vpack.c.bf16 %v440_v22, %v440_v22  ;;  %v800_v24 = vmul.f32 %v440_v22, %v440_v22  ;;  %v1188_v25 = vpop.f32.mrb[2].mxu0  ;;  %v729_v29 = vsel %vm728_vm3, %v440_v22, 0.0  ;;  %v1146_v39 = vpack.c.bf16 %v1526_v35, %v1526_v35  ;;  %v1535_v40 = vpop.f32.mrb[1].mxu1 }
  0xf2   : > { %698 = vst.msk [vmem:[%s1516_s14 + $0x8] sm:$0xf] %vm695_vm2, %v1130_v21  ;;  %v1131_v27 = vpack.c.bf16 %v1188_v25, %v1188_v25  ;;  %v443_v28 = vpop.f32.mrb[3].mxu0  ;;  %v803_v33 = vmul.f32 %v1188_v25, %v1188_v25  ;;  %v1144_v43 = vpack.c.bf16 %v1535_v40, %v1535_v40  ;;  %v1539_v44 = vpop.f32.mrb[2].mxu1  ;;  %v835_v45 = vsel %vm728_vm3, %v802_v26, 0.0 }
  0xf3   : > { %696 = vst.msk [vmem:[%s1516_s14] sm:$0xf] %vm695_vm2, %v1128_v23  ;;  %v1129_v30 = vpack.c.bf16 %v443_v28, %v443_v28  ;;  %v730_v31 = vsel %vm728_vm3, %v443_v28, 0.0  ;;  %v801_v32 = vmul.f32 %v443_v28, %v443_v28  ;;  %v832_v37 = vsel %vm728_vm3, %v800_v24, 0.0  ;;  %714 = vst.msk [vmem:[%s1516_s14 + $0x48] sm:$0xf] %vm695_vm2, %v1146_v39 }
  0xf4   : > { %699 = vst.msk [vmem:[%s1516_s14 + $0xc] sm:$0xf] %vm695_vm2, %v1131_v27  ;;  %v731_v34 = vadd.f32 %v730_v31, %v729_v29  ;;  %v1147_v47 = vpack.c.bf16 %v1539_v44, %v1539_v44  ;;  %v1546_v48 = vpop.f32.mrb[3].mxu1  ;;  %v734_v49 = vsel %vm728_vm3, %v1188_v25, 0.0  ;;  %v837_v50 = vsel %vm728_vm3, %v803_v33, 0.0 }
  0xf5   : > { %697 = vst.msk [vmem:[%s1516_s14 + $0x4] sm:$0xf] %vm695_vm2, %v1129_v30  ;;  %v833_v38 = vsel %vm728_vm3, %v801_v32, 0.0  ;;  %712 = vst.msk [vmem:[%s1516_s14 + $0x40] sm:$0xf] %vm695_vm2, %v1144_v43  ;;  %v1145_v7 = vpack.c.bf16 %v1546_v48, %v1546_v48 }
  0xf6   : > { %v733_v41 = vadd.f32 %v732_v36, %v731_v34  ;;  %v834_v42 = vadd.f32 %v833_v38, %v832_v37  ;;  %715 = vst.msk [vmem:[%s1516_s14 + $0x4c] sm:$0xf] %vm695_vm2, %v1147_v47 }
  0xf7   : > { %v1191_v46 = vpop.f32.mrb[4].mxu0  ;;  %713 = vst.msk [vmem:[%s1516_s14 + $0x44] sm:$0xf] %vm695_vm2, %v1145_v7 }
  0xf8   : > { %v836_v51 = vadd.f32 %v835_v45, %v834_v42  ;;  %v1134_v52 = vpack.c.bf16 %v1191_v46, %v1191_v46  ;;  %v456_v53 = vpop.f32.mrb[5].mxu0  ;;  %v735_v55 = vadd.f32 %v734_v49, %v733_v41  ;;  %v806_v1 = vmul.f32 %v1191_v46, %v1191_v46  ;;  %v1563_v5 = vpop.f32.mrb[4].mxu1 }
  0xf9   : > { %v1132_v54 = vpack.c.bf16 %v456_v53, %v456_v53  ;;  %v736_v56 = vsel %vm728_vm3, %v456_v53, 0.0  ;;  %v804_v57 = vmul.f32 %v456_v53, %v456_v53  ;;  %v1192_v58 = vpop.f32.mrb[6].mxu0  ;;  %v1569_v8 = vpop.f32.mrb[5].mxu1  ;;  %v740_v9 = vsel %vm728_vm3, %v1191_v46, 0.0 }
  0xfa   : > { %702 = vst.msk [vmem:[%s1516_s14 + $0x18] sm:$0xf] %vm695_vm2, %v1134_v52  ;;  %v838_v59 = vadd.f32 %v837_v50, %v836_v51  ;;  %v1135_v60 = vpack.c.bf16 %v1192_v58, %v1192_v58  ;;  %v459_v61 = vpop.f32.mrb[7].mxu0  ;;  %v737_v62 = vadd.f32 %v736_v56, %v735_v55  ;;  %v807_v10 = vmul.f32 %v1192_v58, %v1192_v58  ;;  %v1575_v13 = vpop.f32.mrb[6].mxu1 }
  0xfb   : > { %700 = vst.msk [vmem:[%s1516_s14 + $0x10] sm:$0xf] %vm695_vm2, %v1132_v54  ;;  %v839_v63 = vsel %vm728_vm3, %v804_v57, 0.0  ;;  %v1133_v0 = vpack.c.bf16 %v459_v61, %v459_v61  ;;  %v738_v3 = vsel %vm728_vm3, %v459_v61, 0.0  ;;  %v805_v4 = vmul.f32 %v459_v61, %v459_v61  ;;  %v1579_v17 = vpop.f32.mrb[7].mxu1 }
  0xfc   : > { %v840_v2 = vadd.f32 %v839_v63, %v838_v59  ;;  %703 = vst.msk [vmem:[%s1516_s14 + $0x1c] sm:$0xf] %vm695_vm2, %v1135_v60  ;;  %v739_v6 = vadd.f32 %v738_v3, %v737_v62  ;;  %v1150_v12 = vpack.c.bf16 %v1563_v5, %v1563_v5  ;;  %v843_v18 = vsel %vm728_vm3, %v806_v1, 0.0 }
  0xfd   : > { %701 = vst.msk [vmem:[%s1516_s14 + $0x14] sm:$0xf] %vm695_vm2, %v1133_v0  ;;  %v841_v11 = vsel %vm728_vm3, %v805_v4, 0.0  ;;  %v742_v19 = vsel %vm728_vm3, %v1192_v58, 0.0  ;;  %v845_v27 = vsel %vm728_vm3, %v807_v10, 0.0  ;;  %v1148_v43 = vpack.c.bf16 %v1569_v8, %v1569_v8 }
  0xfe   : > { %v741_v14 = vadd.f32 %v740_v9, %v739_v6  ;;  %v842_v15 = vadd.f32 %v841_v11, %v840_v2  ;;  %718 = vst.msk [vmem:[%s1516_s14 + $0x58] sm:$0xf] %vm695_vm2, %v1150_v12  ;;  %v1151_v54 = vpack.c.bf16 %v1575_v13, %v1575_v13 }
  0xff   : > { %v1195_v16 = vpop.f32.mrb[8].mxu0  ;;  %716 = vst.msk [vmem:[%s1516_s14 + $0x50] sm:$0xf] %vm695_vm2, %v1148_v43 }
 0x100   : > { %v1138_v20 = vpack.c.bf16 %v1195_v16, %v1195_v16  ;;  %v472_v21 = vpop.f32.mrb[9].mxu0  ;;  %v844_v22 = vadd.f32 %v843_v18, %v842_v15  ;;  %v743_v24 = vadd.f32 %v742_v19, %v741_v14  ;;  %v810_v34 = vmul.f32 %v1195_v16, %v1195_v16  ;;  %v1595_v39 = vpop.f32.mrb[8].mxu1  ;;  %719 = vst.msk [vmem:[%s1516_s14 + $0x5c] sm:$0xf] %vm695_vm2, %v1151_v54 }
 0x101   : > { %v1136_v23 = vpack.c.bf16 %v472_v21, %v472_v21  ;;  %v744_v25 = vsel %vm728_vm3, %v472_v21, 0.0  ;;  %v1196_v26 = vpop.f32.mrb[10].mxu0  ;;  %v808_v28 = vmul.f32 %v472_v21, %v472_v21  ;;  %v1601_v45 = vpop.f32.mrb[9].mxu1  ;;  %v748_v46 = vsel %vm728_vm3, %v1195_v16, 0.0 }
 0x102   : > { %706 = vst.msk [vmem:[%s1516_s14 + $0x28] sm:$0xf] %vm695_vm2, %v1138_v20  ;;  %v1139_v29 = vpack.c.bf16 %v1196_v26, %v1196_v26  ;;  %v475_v30 = vpop.f32.mrb[11].mxu0  ;;  %v745_v31 = vadd.f32 %v744_v25, %v743_v24  ;;  %v846_v32 = vadd.f32 %v845_v27, %v844_v22  ;;  %v811_v47 = vmul.f32 %v1196_v26, %v1196_v26  ;;  %v1605_v50 = vpop.f32.mrb[10].mxu1 }
 0x103   : > { %704 = vst.msk [vmem:[%s1516_s14 + $0x20] sm:$0xf] %vm695_vm2, %v1136_v23  ;;  %v1137_v33 = vpack.c.bf16 %v475_v30, %v475_v30  ;;  %v847_v36 = vsel %vm728_vm3, %v808_v28, 0.0  ;;  %v746_v37 = vsel %vm728_vm3, %v475_v30, 0.0  ;;  %v809_v38 = vmul.f32 %v475_v30, %v475_v30  ;;  %v1611_v55 = vpop.f32.mrb[11].mxu1 }
 0x104   : > { %707 = vst.msk [vmem:[%s1516_s14 + $0x2c] sm:$0xf] %vm695_vm2, %v1139_v29  ;;  %v848_v41 = vadd.f32 %v847_v36, %v846_v32  ;;  %v747_v42 = vadd.f32 %v746_v37, %v745_v31  ;;  %v851_v56 = vsel %vm728_vm3, %v810_v34, 0.0  ;;  %v750_v57 = vsel %vm728_vm3, %v1196_v26, 0.0 }
 0x105   : > { %705 = vst.msk [vmem:[%s1516_s14 + $0x24] sm:$0xf] %vm695_vm2, %v1137_v33  ;;  %v849_v49 = vsel %vm728_vm3, %v809_v38, 0.0  ;;  %v853_v1 = vsel %vm728_vm3, %v811_v47, 0.0  ;;  %v1149_v19 = vpack.c.bf16 %v1579_v17, %v1579_v17  ;;  %v816_v24 = vmul.f32 %v1535_v40, %v1535_v40 }
 0x106   : > { %v749_v51 = vadd.f32 %v748_v46, %v747_v42  ;;  %v850_v52 = vadd.f32 %v849_v49, %v848_v41  ;;  %v1154_v28 = vpack.c.bf16 %v1595_v39, %v1595_v39  ;;  %v760_v32 = vsel %vm728_vm3, %v1535_v40, 0.0 }
 0x107   : > { %v1199_v53 = vpop.f32.mrb[12].mxu0  ;;  %717 = vst.msk [vmem:[%s1516_s14 + $0x54] sm:$0xf] %vm695_vm2, %v1149_v19  ;;  %v1152_v33 = vpack.c.bf16 %v1601_v45, %v1601_v45  ;;  %v1155_v37 = vpack.c.bf16 %v1605_v50, %v1605_v50  ;;  %v863_v41 = vsel %vm728_vm3, %v816_v24, 0.0  ;;  %v817_v42 = vmul.f32 %v1546_v48, %v1546_v48 }
 0x108   : > { %v1142_v58 = vpack.c.bf16 %v1199_v53, %v1199_v53  ;;  %v488_v59 = vpop.f32.mrb[13].mxu0  ;;  %v852_v60 = vadd.f32 %v851_v56, %v850_v52  ;;  %v751_v62 = vadd.f32 %v750_v57, %v749_v51  ;;  %v814_v10 = vmul.f32 %v1199_v53, %v1199_v53  ;;  %v1627_v15 = vpop.f32.mrb[12].mxu1  ;;  %722 = vst.msk [vmem:[%s1516_s14 + $0x68] sm:$0xf] %vm695_vm2, %v1154_v28 }
 0x109   : > { %v1140_v61 = vpack.c.bf16 %v488_v59, %v488_v59  ;;  %v752_v63 = vsel %vm728_vm3, %v488_v59, 0.0  ;;  %v1200_v0 = vpop.f32.mrb[14].mxu0  ;;  %v812_v2 = vmul.f32 %v488_v59, %v488_v59  ;;  %v1633_v20 = vpop.f32.mrb[13].mxu1  ;;  %v756_v21 = vsel %vm728_vm3, %v1199_v53, 0.0  ;;  %720 = vst.msk [vmem:[%s1516_s14 + $0x60] sm:$0xf] %vm695_vm2, %v1152_v33 }
 0x10a   : > { %710 = vst.msk [vmem:[%s1516_s14 + $0x38] sm:$0xf] %vm695_vm2, %v1142_v58  ;;  %v1143_v3 = vpack.c.bf16 %v1200_v0, %v1200_v0  ;;  %v491_v4 = vpop.f32.mrb[15].mxu0  ;;  %v753_v6 = vadd.f32 %v752_v63, %v751_v62  ;;  %v854_v7 = vadd.f32 %v853_v1, %v852_v60  ;;  %v815_v22 = vmul.f32 %v1200_v0, %v1200_v0  ;;  %v1639_v25 = vpop.f32.mrb[14].mxu1 }
 0x10b   : > { %708 = vst.msk [vmem:[%s1516_s14 + $0x30] sm:$0xf] %vm695_vm2, %v1140_v61  ;;  %v1141_v9 = vpack.c.bf16 %v491_v4, %v491_v4  ;;  %v855_v11 = vsel %vm728_vm3, %v812_v2, 0.0  ;;  %v754_v12 = vsel %vm728_vm3, %v491_v4, 0.0  ;;  %v813_v14 = vmul.f32 %v491_v4, %v491_v4  ;;  %v1645_v29 = vpop.f32.mrb[15].mxu1 }
 0x10c   : > { %711 = vst.msk [vmem:[%s1516_s14 + $0x3c] sm:$0xf] %vm695_vm2, %v1143_v3  ;;  %v856_v16 = vadd.f32 %v855_v11, %v854_v7  ;;  %v755_v18 = vadd.f32 %v754_v12, %v753_v6  ;;  %v859_v30 = vsel %vm728_vm3, %v814_v10, 0.0  ;;  %v758_v31 = vsel %vm728_vm3, %v1200_v0, 0.0  ;;  %723 = vst.msk [vmem:[%s1516_s14 + $0x6c] sm:$0xf] %vm695_vm2, %v1155_v37 }
 0x10d   : > { %709 = vst.msk [vmem:[%s1516_s14 + $0x34] sm:$0xf] %vm695_vm2, %v1141_v9  ;;  %v857_v23 = vsel %vm728_vm3, %v813_v14, 0.0  ;;  %v861_v38 = vsel %vm728_vm3, %v815_v22, 0.0  ;;  %v1153_v40 = vpack.c.bf16 %v1611_v55, %v1611_v55  ;;  %v818_v47 = vmul.f32 %v1526_v35, %v1526_v35 }
 0x10e   : > { %v757_v26 = vadd.f32 %v756_v21, %v755_v18  ;;  %v858_v27 = vadd.f32 %v857_v23, %v856_v16  ;;  %v762_v49 = vsel %vm728_vm3, %v1546_v48, 0.0  ;;  %v1158_v51 = vpack.c.bf16 %v1627_v15, %v1627_v15 }
 0x10f   : > { %721 = vst.msk [vmem:[%s1516_s14 + $0x64] sm:$0xf] %vm695_vm2, %v1153_v40  ;;  %v764_v52 = vsel %vm728_vm3, %v1526_v35, 0.0  ;;  %v1156_v56 = vpack.c.bf16 %v1633_v20, %v1633_v20  ;;  %v819_v57 = vmul.f32 %v1539_v44, %v1539_v44  ;;  %v865_v58 = vsel %vm728_vm3, %v817_v42, 0.0 }
 0x110   : > { %v860_v34 = vadd.f32 %v859_v30, %v858_v27  ;;  %v759_v36 = vadd.f32 %v758_v31, %v757_v26  ;;  %v820_v48 = vmul.f32 %v1569_v8, %v1569_v8  ;;  %726 = vst.msk [vmem:[%s1516_s14 + $0x78] sm:$0xf] %vm695_vm2, %v1158_v51  ;;  %v1159_v59 = vpack.c.bf16 %v1639_v25, %v1639_v25 }
 0x111   : > { %724 = vst.msk [vmem:[%s1516_s14 + $0x70] sm:$0xf] %vm695_vm2, %v1156_v56  ;;  %v867_v61 = vsel %vm728_vm3, %v818_v47, 0.0  ;;  %v766_v62 = vsel %vm728_vm3, %v1539_v44, 0.0  ;;  %v768_v63 = vsel %vm728_vm3, %v1569_v8, 0.0  ;;  %v1157_v0 = vpack.c.bf16 %v1645_v29, %v1645_v29 }
 0x112   : > { %v761_v43 = vadd.f32 %v760_v32, %v759_v36  ;;  %v862_v46 = vadd.f32 %v861_v38, %v860_v34  ;;  %727 = vst.msk [vmem:[%s1516_s14 + $0x7c] sm:$0xf] %vm695_vm2, %v1159_v59  ;;  %v869_v3 = vsel %vm728_vm3, %v819_v57, 0.0  ;;  %v871_v4 = vsel %vm728_vm3, %v820_v48, 0.0 }
 0x113   : > { %v821_v6 = vmul.f32 %v1579_v17, %v1579_v17  ;;  %725 = vst.msk [vmem:[%s1516_s14 + $0x74] sm:$0xf] %vm695_vm2, %v1157_v0  ;;  %v822_v8 = vmul.f32 %v1563_v5, %v1563_v5  ;;  %v770_v9 = vsel %vm728_vm3, %v1579_v17, 0.0  ;;  %v772_v12 = vsel %vm728_vm3, %v1563_v5, 0.0 }
 0x114   : > { %v864_v53 = vadd.f32 %v863_v41, %v862_v46  ;;  %v763_v54 = vadd.f32 %v762_v49, %v761_v43  ;;  %v823_v14 = vmul.f32 %v1575_v13, %v1575_v13  ;;  %v824_v18 = vmul.f32 %v1601_v45, %v1601_v45 }
 0x115   : > { %v873_v16 = vsel %vm728_vm3, %v821_v6, 0.0  ;;  %v875_v22 = vsel %vm728_vm3, %v822_v8, 0.0  ;;  %v774_v17 = vsel %vm728_vm3, %v1575_v13, 0.0  ;;  %v776_v23 = vsel %vm728_vm3, %v1601_v45, 0.0 }
 0x116   : > { %v765_v35 = vadd.f32 %v764_v52, %v763_v54  ;;  %v866_v60 = vadd.f32 %v865_v58, %v864_v53  ;;  %v877_v26 = vsel %vm728_vm3, %v823_v14, 0.0  ;;  %v879_v27 = vsel %vm728_vm3, %v824_v18, 0.0 }
 0x117   : > { %v825_v28 = vmul.f32 %v1611_v55, %v1611_v55  ;;  %v826_v32 = vmul.f32 %v1595_v39, %v1595_v39  ;;  %v778_v13 = vsel %vm728_vm3, %v1611_v55, 0.0  ;;  %v780_v45 = vsel %vm728_vm3, %v1595_v39, 0.0 }
 0x118   : > { %v868_v1 = vadd.f32 %v867_v61, %v866_v60  ;;  %v767_v2 = vadd.f32 %v766_v62, %v765_v35  ;;  %v827_v36 = vmul.f32 %v1605_v50, %v1605_v50  ;;  %v828_v38 = vmul.f32 %v1633_v20, %v1633_v20 }
 0x119   : > { %v881_v37 = vsel %vm728_vm3, %v825_v28, 0.0  ;;  %v883_v40 = vsel %vm728_vm3, %v826_v32, 0.0  ;;  %v782_v55 = vsel %vm728_vm3, %v1605_v50, 0.0  ;;  %v784_v43 = vsel %vm728_vm3, %v1633_v20, 0.0 }
 0x11a   : > { %v769_v44 = vadd.f32 %v768_v63, %v767_v2  ;;  %v870_v7 = vadd.f32 %v869_v3, %v868_v1  ;;  %v885_v47 = vsel %vm728_vm3, %v827_v36, 0.0  ;;  %v887_v49 = vsel %vm728_vm3, %v828_v38, 0.0 }
 0x11b   : > { %v829_v51 = vmul.f32 %v1645_v29, %v1645_v29  ;;  %v830_v54 = vmul.f32 %v1627_v15, %v1627_v15  ;;  %v786_v50 = vsel %vm728_vm3, %v1645_v29, 0.0  ;;  %v788_v57 = vsel %vm728_vm3, %v1627_v15, 0.0 }
 0x11c   : > { %v872_v10 = vadd.f32 %v871_v4, %v870_v7  ;;  %v771_v11 = vadd.f32 %v770_v9, %v769_v44  ;;  %v831_v58 = vmul.f32 %v1639_v25, %v1639_v25  ;;  %v790_v61 = vsel %vm728_vm3, %v1639_v25, 0.0 }
 0x11d   : > { %v889_v48 = vsel %vm728_vm3, %v829_v51, 0.0  ;;  %v891_v60 = vsel %vm728_vm3, %v830_v54, 0.0 }
 0x11e   : > { %v773_v19 = vadd.f32 %v772_v12, %v771_v11  ;;  %v874_v21 = vadd.f32 %v873_v16, %v872_v10  ;;  %v893_v63 = vsel %vm728_vm3, %v831_v58, 0.0 }
 0x120   : > { %v876_v24 = vadd.f32 %v875_v22, %v874_v21  ;;  %v775_v5 = vadd.f32 %v774_v17, %v773_v19 }
 0x122   : > { %v777_v30 = vadd.f32 %v776_v23, %v775_v5  ;;  %v878_v31 = vadd.f32 %v877_v26, %v876_v24 }
 0x124   : > { %v880_v33 = vadd.f32 %v879_v27, %v878_v31  ;;  %v779_v34 = vadd.f32 %v778_v13, %v777_v30 }
 0x126   : > { %v781_v41 = vadd.f32 %v780_v45, %v779_v34  ;;  %v882_v42 = vadd.f32 %v881_v37, %v880_v33 }
 0x128   : > { %v884_v46 = vadd.f32 %v883_v40, %v882_v42  ;;  %v783_v39 = vadd.f32 %v782_v55, %v781_v41 }
 0x12a   : > { %v785_v52 = vadd.f32 %v784_v43, %v783_v39  ;;  %v886_v53 = vadd.f32 %v885_v47, %v884_v46 }
 0x12c   : > { %v888_v56 = vadd.f32 %v887_v49, %v886_v53  ;;  %v787_v20 = vadd.f32 %v786_v50, %v785_v52 }
 0x12e   : > { %v789_v59 = vadd.f32 %v788_v57, %v787_v20  ;;  %v890_v35 = vadd.f32 %v889_v48, %v888_v56 }
 0x130   : > { %v791_v62 = vadd.f32 %v790_v61, %v789_v59  ;;  %v892_v29 = vadd.f32 %v891_v60, %v890_v35 }
 0x132   : > { %v792_v0 = vrot.slane %v791_v62, 4  ;;  %v894_v1 = vadd.f32 %v893_v63, %v892_v29 }
 0x134   : > { %v793_v15 = vadd.f32 %v792_v0, %v791_v62  ;;  %v895_v2 = vrot.slane %v894_v1, 4 }
 0x136   : > { %v794_v3 = vrot.slane %v793_v15, 2  ;;  %v896_v4 = vadd.f32 %v895_v2, %v894_v1 }
 0x138   : > { %v795_v6 = vadd.f32 %v794_v3, %v793_v15  ;;  %v897_v44 = vrot.slane %v896_v4, 2 }
 0x13a   : > { %v796_v25 = vrot.slane %v795_v6, 1  ;;  %v898_v7 = vadd.f32 %v897_v44, %v896_v4 }
 0x13c   : > { %v797_v8 = vadd.f32 %v796_v25, %v795_v6  ;;  %v899_v9 = vrot.slane %v898_v7, 1 }
 0x13e   : > { %799 = vst.msk [vmem:[%s201_s23] sm:$0x1] %vm798_vm4, %v797_v8  ;;  %v900_v10 = vadd.f32 %v899_v9, %v898_v7 }
 0x13f   : > { %1301 = shalt.err (!%p1298_p3)
}
 0x140   : > { %s1302_s14 = scalar_lea.hbm %s1769_s6, 16  ;;  %s1306_s30 = scalar_lea.hbm %s1848_s3, 32 }
 0x141   : > { %p1303_p4 = scmp.ne.s32.totalorder %s1769_s6, %s1302_s14  ;;  %p1307_p9 = scmp.lt.u32.totalorder %s1769_s6, %s1848_s3 }
 0x142   : > { %p1308_p10 = scmp.lt.u32.totalorder %s1306_s30, %s1302_s14  ;;  %p1310_p12 = scmp.lt.u32.totalorder %s1302_s14, %s1769_s6 }
 0x143   : > { %p1304_p7 = pnand %p1303_p4, %p1449_p5 }
 0x144   : > { %p1309_p11 = por %p1308_p10, %p1307_p9 }
 0x145   : > { %p1305_p8 = pneg %p1304_p7 }
 0x146   : > { %p1311_p13 = por %p1310_p12, %p1309_p11 }
 0x148   : > { %p1312_p0 = pnand %p1311_p13, %p1305_p8 }
 0x14a   : > { %1315 = shalt.err (!%p1312_p0)
}
 0x14b   : > { %1225 = dma.vmem_to_hbm [thread:$0]  (%p1449_p5), %s1771_s27, 16, %s1769_s6, %s908_s9   ;;  %901 = vst.msk [vmem:[%s207_s28] sm:$0x1] %vm798_vm4, %v900_v10 }
 0x14c   : > { %s912_s7 = scalar_lea.sflag [#allocation5], %s1759_s20  ;;  %s1316_s10 = scalar_lea.vmem %s1779_s29, 16 }
 0x14d   : > { %p1317_p1 = scmp.ne.s32.totalorder %s1779_s29, %s1316_s10  ;;  %s1385_s11 = smov [#allocation4]  }
 0x14e   : > { %s1320_s12 = sshll.u32 %s1385_s11, 4  ;;  %s1321_s12 = int_to_ptr.vmem [resolvable:$false] %s1320_s12 }
 0x14f   : > { %p1318_p2 = pnand %p1317_p1, %p1449_p5  ;;  %s1322_s13 = scalar_lea.vmem %s1321_s12, 32 }
 0x150   : > { %p1323_p4 = scmp.lt.s32.totalorder %s1779_s29, %s1321_s12  ;;  %p1324_p7 = scmp.lt.s32.totalorder %s1322_s13, %s1316_s10 }
 0x151   : > { %p1319_p3 = pneg %p1318_p2 }
 0x152   : > { %p1325_p8 = por %p1324_p7, %p1323_p4 }
 0x154   : > { %p1326_p9 = pnand %p1325_p8, %p1319_p3 }
 0x156   : > { %1329 = shalt.err (!%p1326_p9)
}
 0x157   : > { %s1330_s20 = scalar_lea.hbm %s1777_s8, 16  ;;  %s1334_s6 = scalar_lea.hbm %s1849_s4, 32 }
 0x158   : > { %p1331_p10 = scmp.ne.s32.totalorder %s1777_s8, %s1330_s20  ;;  %p1335_p13 = scmp.lt.u32.totalorder %s1777_s8, %s1849_s4 }
 0x159   : > { %p1336_p0 = scmp.lt.u32.totalorder %s1334_s6, %s1330_s20  ;;  %p1338_p2 = scmp.lt.u32.totalorder %s1330_s20, %s1777_s8 }
 0x15a   : > { %p1332_p11 = pnand %p1331_p10, %p1449_p5 }
 0x15b   : > { %p1337_p1 = por %p1336_p0, %p1335_p13 }
 0x15c   : > { %p1333_p12 = pneg %p1332_p11 }
 0x15d   : > { %p1339_p3 = por %p1338_p2, %p1337_p1 }
 0x15f   : > { %p1340_p4 = pnand %p1339_p3, %p1333_p12 }
 0x161   : > { %1343 = shalt.err (!%p1340_p4)
}
 0x162   : > { %1226 = dma.vmem_to_hbm [thread:$0]  (%p1449_p5), %s1779_s29, 16, %s1777_s8, %s912_s7  }
 0x163 PF: > { %p1236_p7 = scmp.ge.s32.totalorder %s1382_s18, 2  ;;  %s961_s22 = sand.u32 1, %s1370_s15  }
 0x164   : > { %s962_s23 = scalar_lea.sflag [#allocation3], %s961_s22 }
 0x165   : > { %p1230_p8 = pnand %p1236_p7, %p1453_p6 }
 0x167   : > { %1361 = dma.done.wait (!%p1230_p8), %s962_s23, 16  }
 0x168   : > { %1363 = vsyncadd (!%p1230_p8), %s962_s23, 4294967280  ;;  %s970_s30 = scalar_lea.sflag [#allocation5], %s961_s22 }
 0x169   : > { %1365 = dma.done.wait (!%p1230_p8), %s970_s30, 16  }
 0x16a   : > { %1367 = vsyncadd (!%p1230_p8), %s970_s30, 4294967280  ;;  %p18_p5 = scmp.ge.s32.totalorder %s1436_s21, 4   ;;  %s1852_s15 = smov %s1374_s16 }
 0x16b   : > { %s1853_s16 = smov %s1378_s17  ;;  %s1854_s17 = smov %s1447_s24 }
 0x16c   : > { %s1855_s18 = smov %s1436_s21  ;;  %20 = sbr.rel (!%p18_p5) target bundleno = 5 (0x5), region = 92 }
 0x173   :  { %974 = vsyncpa [#allocation3], 1 }
 0x174   :  { %976 = vsyncpa [#allocation3 + $0x1], 1 }
 0x175   :  { %977 = vsyncpa [#allocation5], 1 }
 0x176   :  { %979 = vsyncpa [#allocation5 + $0x1], 1 }

</bundles_post_ra>
